<compile_context>
chip_gen: v7x
topology: tpu7x:2x2x1
jax: 0.10.0
libtpu: 0.0.40
codegen_flags: <defaults>
</compile_context>

<pallas_src>
import functools
import math

import jax
import jax.numpy as jnp
from jax import lax
from jax.experimental import pallas as pl
from jax.experimental.pallas import tpu as pltpu

_LANES = 128


def _ce_kernel(logits_ref, labels_ref, loss_ref, cnt_ref, *,
               ignore_id, hw, tile_pix, need_tail_mask):
    """One pixel tile of one image: masked CE partial sum + valid count."""
    x = logits_ref[0].astype(jnp.float32)            # (C, T)  classes on sublanes
    labels = labels_ref[0]                           # (1, T)  int32
    c, t = x.shape

    # numerically stable log-sum-exp over the class (sublane) axis.
    m = jnp.max(x, axis=0, keepdims=True)            # (1, T)
    sumexp = jnp.sum(jnp.exp(x - m), axis=0, keepdims=True)
    lse = m + jnp.log(sumexp)                        # (1, T)

    # gather the target-class logit via compare+select against a class iota.
    class_ids = lax.broadcasted_iota(jnp.int32, (c, t), 0)
    tgt = jnp.sum(jnp.where(class_ids == labels, x, 0.0),
                  axis=0, keepdims=True)             # (1, T)

    per_pixel = lse - tgt                            # (1, T)
    valid = labels != ignore_id                      # (1, T)
    if need_tail_mask:
        # last pixel tile may extend past H*W: mask the out-of-bounds lanes
        # (their logits / labels are undefined padding).
        p = pl.program_id(1)
        pix = p * tile_pix + lax.broadcasted_iota(jnp.int32, (1, t), 1)
        valid = jnp.logical_and(valid, pix < hw)

    masked = jnp.where(valid, per_pixel, 0.0)        # (1, T)
    loss_ref[...] = jnp.sum(masked, axis=1, keepdims=True)[None]               # (1,1,1)
    cnt_ref[...] = jnp.sum(valid.astype(jnp.float32), axis=1, keepdims=True)[None]


def semseg_cross_entropy(logits, labels, *, num_classes=19, ignore_id=19,
                         tile_pixels=32768):
    """logits: (N, C, H, W) float, labels: (N, Ht, Wt) int. Returns scalar loss."""
    del num_classes  # implied by logits.shape[1]
    N, C, H, W = logits.shape
    Ht, Wt = labels.shape[1], labels.shape[2]
    if (H, W) != (Ht, Wt):
        # bilinear, half-pixel centers == F.interpolate(align_corners=False).
        # TODO(synk): fuse this 2x2 gather into the kernel (read only the
        # low-res logits) instead of materializing full-res logits in HBM.
        logits = jax.image.resize(logits, (N, C, Ht, Wt), method="bilinear",
                                  antialias=False)
        H, W = Ht, Wt

    HW = H * W
    x3 = logits.reshape(N, C, HW)                    # zero-copy (NCHW contiguous)
    t3 = labels.reshape(N, 1, HW).astype(jnp.int32)  # labels are tiny (4 B/pixel)

    # Pixel tile selection: lane-aligned (multiple of 128) unless it covers the
    # whole image; for big images keep ~8 total grid steps so both v7x
    # TensorCores get work and the pipeline reaches steady state.
    wanted_tiles = max(1, math.ceil(8 / N))
    tile_pix = min(tile_pixels, HW)
    if wanted_tiles > 1 and HW >= wanted_tiles * _LANES:
        per_tile = (HW + wanted_tiles - 1) // wanted_tiles
        per_tile = ((per_tile + _LANES - 1) // _LANES) * _LANES
        tile_pix = min(tile_pix, per_tile)
    if tile_pix < HW:
        tile_pix = max(_LANES, (tile_pix // _LANES) * _LANES)
    n_ptiles = pl.cdiv(HW, tile_pix)
    need_tail_mask = (HW % tile_pix) != 0

    kernel = functools.partial(_ce_kernel, ignore_id=ignore_id, hw=HW,
                               tile_pix=tile_pix, need_tail_mask=need_tail_mask)

    n_steps = N * n_ptiles
    loss_parts, cnt_parts = pl.pallas_call(
        kernel,
        out_shape=(
            jax.ShapeDtypeStruct((n_steps, 1, 1), jnp.float32),
            jax.ShapeDtypeStruct((n_steps, 1, 1), jnp.float32),
        ),
        grid=(N, n_ptiles),
        in_specs=[
            pl.BlockSpec((1, C, tile_pix), lambda n, p: (n, 0, p)),
            pl.BlockSpec((1, 1, tile_pix), lambda n, p: (n, 0, p)),
        ],
        out_specs=(
            pl.BlockSpec((1, 1, 1), lambda n, p: (n * n_ptiles + p, 0, 0)),
            pl.BlockSpec((1, 1, 1), lambda n, p: (n * n_ptiles + p, 0, 0)),
        ),
        compiler_params=pltpu.CompilerParams(
            dimension_semantics=("parallel", "parallel"),
            vmem_limit_bytes=48 * 1024 * 1024),
    )(x3, t3)

    total_loss = jnp.sum(loss_parts)
    # per-tile counts are exact in f32 (<= 2^24); sum across tiles in int32.
    total_cnt = jnp.sum(cnt_parts.astype(jnp.int32))
    # NOTE: division by zero (-> NaN) when every label == ignore_id matches
    # PyTorch's F.cross_entropy behaviour on an all-ignored batch.
    return total_loss / total_cnt.astype(jnp.float32)


def _reference_loss(logits, labels, ignore_id):
    """Pure-JAX reference (logits already at label resolution)."""
    x = jnp.transpose(logits, (0, 2, 3, 1)).astype(jnp.float32)
    logp = jax.nn.log_softmax(x, axis=-1)
    t = labels.astype(jnp.int32)
    safe_t = jnp.where(t == ignore_id, 0, t)
    nll = -jnp.take_along_axis(logp, safe_t[..., None], axis=-1)[..., 0]
    valid = (t != ignore_id).astype(jnp.float32)
    return jnp.sum(nll * valid) / jnp.sum(valid)


if __name__ == "__main__":
    # Module defaults: num_classes=19, ignore_id=19.
    num_classes, ignore_id = 19, 19
    N, H, W = 2, 16, 16

    key = jax.random.PRNGKey(0)
    k1, k2, k3, k4, k5, k6 = jax.random.split(key, 6)

    # Case 1: logits already at the label resolution (NCHW, PyTorch convention).
    logits = jax.random.normal(k1, (N, num_classes, H, W), dtype=jnp.float32)
    labels = jax.random.randint(k2, (N, H, W), 0, num_classes, dtype=jnp.int32)
    ignore_mask = jax.random.bernoulli(k3, 0.1, (N, H, W))
    labels = jnp.where(ignore_mask, ignore_id, labels)

    loss = jax.block_until_ready(semseg_cross_entropy(
        logits, labels, num_classes=num_classes, ignore_id=ignore_id))
    ref = jax.block_until_ready(_reference_loss(logits, labels, ignore_id))
    assert jnp.allclose(loss, ref, rtol=1e-5, atol=1e-5), (loss, ref)

    # Case 2: low-res logits -> bilinear upsample path (align_corners=False).
    logits_lo = jax.random.normal(k4, (N, num_classes, 8, 8), dtype=jnp.float32)
    loss2 = jax.block_until_ready(semseg_cross_entropy(
        logits_lo, labels, num_classes=num_classes, ignore_id=ignore_id))
    logits_up = jax.image.resize(
        logits_lo, (N, num_classes, H, W), method="bilinear", antialias=False)
    ref2 = jax.block_until_ready(_reference_loss(logits_up, labels, ignore_id))
    assert jnp.allclose(loss2, ref2, rtol=1e-5, atol=1e-5), (loss2, ref2)

    # Case 3: multi-tile grid with a partial (masked) last pixel tile.
    H3, W3 = 24, 20                                   # HW = 480, not /128
    logits3 = jax.random.normal(k5, (1, num_classes, H3, W3), dtype=jnp.float32)
    labels3 = jax.random.randint(k6, (1, H3, W3), 0, num_classes, dtype=jnp.int32)
    labels3 = labels3.at[0, 0, :5].set(ignore_id)
    loss3 = jax.block_until_ready(semseg_cross_entropy(
        logits3, labels3, num_classes=num_classes, ignore_id=ignore_id,
        tile_pixels=128))
    ref3 = jax.block_until_ready(_reference_loss(logits3, labels3, ignore_id))
    assert jnp.allclose(loss3, ref3, rtol=1e-5, atol=1e-5), (loss3, ref3)

    # TODO(synk): the PyTorch module's step_counter / periodic print is host
    # logging, not kernel compute; omitted here.
    print("KERNEL_OK")
</pallas_src>

<mosaic_0001>
module attributes {stable_mosaic.version = 11 : i64} {
  func.func @_ce_kernel(%arg0: i32, %arg1: i32, %arg2: memref<1x19x256xf32, #tpu.memory_space<vmem>>, %arg3: memref<1x1x256xi32, #tpu.memory_space<vmem>>, %arg4: memref<1x1x1xf32, #tpu.memory_space<vmem>>, %arg5: memref<1x1x1xf32, #tpu.memory_space<vmem>>) attributes {dimension_semantics = [#tpu.dimension_semantics<parallel>, #tpu.dimension_semantics<parallel>], iteration_bounds = array<i64: 2, 1>, scalar_prefetch = 0 : i64, scratch_operands = 0 : i64, tpu.core_type = #tpu.core_type<tc>, window_params = [{transform_indices = @transform_0, window_bounds = array<i64: 1, 19, 256>}, {transform_indices = @transform_1, window_bounds = array<i64: 1, 1, 256>}, {transform_indices = @transform_2, window_bounds = array<i64: 1, 1, 1>}, {transform_indices = @transform_3, window_bounds = array<i64: 1, 1, 1>}]} {
    %c0 = arith.constant 0 : index
    %c0_0 = arith.constant 0 : index
    %c0_1 = arith.constant 0 : index
    %0 = vector.load %arg2[%c0, %c0_0, %c0_1] : memref<1x19x256xf32, #tpu.memory_space<vmem>>, vector<1x19x256xf32>
    %1 = vector.shape_cast %0 : vector<1x19x256xf32> to vector<19x256xf32>
    %c0_2 = arith.constant 0 : index
    %c0_3 = arith.constant 0 : index
    %c0_4 = arith.constant 0 : index
    %2 = vector.load %arg3[%c0_2, %c0_3, %c0_4] : memref<1x1x256xi32, #tpu.memory_space<vmem>>, vector<1x1x256xi32>
    %3 = vector.shape_cast %2 : vector<1x1x256xi32> to vector<1x256xi32>
    %cst = arith.constant dense<0xFF800000> : vector<256xf32>
    %4 = vector.multi_reduction <maximumf>, %1, %cst [0] : vector<19x256xf32> to vector<256xf32>
    %5 = vector.shape_cast %4 : vector<256xf32> to vector<1x256xf32>
    %6 = vector.broadcast %5 : vector<1x256xf32> to vector<19x256xf32>
    %7 = arith.subf %1, %6 : vector<19x256xf32>
    %8 = math.exp %7 : vector<19x256xf32>
    %cst_5 = arith.constant dense<0.000000e+00> : vector<256xf32>
    %9 = vector.multi_reduction <add>, %8, %cst_5 [0] : vector<19x256xf32> to vector<256xf32>
    %10 = vector.shape_cast %9 : vector<256xf32> to vector<1x256xf32>
    %11 = math.log %10 : vector<1x256xf32>
    %12 = arith.addf %5, %11 : vector<1x256xf32>
    %13 = tpu.iota {dimensions = array<i32: 0>} : vector<19x256xi32>
    %14 = vector.broadcast %3 : vector<1x256xi32> to vector<19x256xi32>
    %15 = arith.cmpi eq, %13, %14 : vector<19x256xi32>
    %cst_6 = arith.constant 0.000000e+00 : f32
    %16 = vector.broadcast %cst_6 : f32 to vector<19x256xf32>
    %17 = arith.select %15, %1, %16 : vector<19x256xi1>, vector<19x256xf32>
    %cst_7 = arith.constant dense<0.000000e+00> : vector<256xf32>
    %18 = vector.multi_reduction <add>, %17, %cst_7 [0] : vector<19x256xf32> to vector<256xf32>
    %19 = vector.shape_cast %18 : vector<256xf32> to vector<1x256xf32>
    %20 = arith.subf %12, %19 : vector<1x256xf32>
    %c19_i32 = arith.constant 19 : i32
    %21 = vector.broadcast %c19_i32 : i32 to vector<1x256xi32>
    %22 = arith.cmpi ne, %3, %21 : vector<1x256xi32>
    %cst_8 = arith.constant 0.000000e+00 : f32
    %23 = vector.broadcast %cst_8 : f32 to vector<1x256xf32>
    %24 = arith.select %22, %20, %23 : vector<1x256xi1>, vector<1x256xf32>
    %cst_9 = arith.constant dense<0.000000e+00> : vector<1xf32>
    %25 = vector.multi_reduction <add>, %24, %cst_9 [1] : vector<1x256xf32> to vector<1xf32>
    %26 = vector.shape_cast %25 : vector<1xf32> to vector<1x1xf32>
    %27 = vector.shape_cast %26 : vector<1x1xf32> to vector<1x1x1xf32>
    %c0_10 = arith.constant 0 : index
    %c0_11 = arith.constant 0 : index
    %c0_12 = arith.constant 0 : index
    %28 = vector.load %arg4[%c0_10, %c0_11, %c0_12] : memref<1x1x1xf32, #tpu.memory_space<vmem>>, vector<1x1x1xf32>
    tpu.vector_store %arg4[%c0_10, %c0_11, %c0_12], %27 {strides = array<i32>} : memref<1x1x1xf32, #tpu.memory_space<vmem>>, vector<1x1x1xf32>,
    %29 = arith.extui %22 : vector<1x256xi1> to vector<1x256xi32>
    %30 = arith.sitofp %29 : vector<1x256xi32> to vector<1x256xf32>
    %cst_13 = arith.constant dense<0.000000e+00> : vector<1xf32>
    %31 = vector.multi_reduction <add>, %30, %cst_13 [1] : vector<1x256xf32> to vector<1xf32>
    %32 = vector.shape_cast %31 : vector<1xf32> to vector<1x1xf32>
    %33 = vector.shape_cast %32 : vector<1x1xf32> to vector<1x1x1xf32>
    %c0_14 = arith.constant 0 : index
    %c0_15 = arith.constant 0 : index
    %c0_16 = arith.constant 0 : index
    %34 = vector.load %arg5[%c0_14, %c0_15, %c0_16] : memref<1x1x1xf32, #tpu.memory_space<vmem>>, vector<1x1x1xf32>
    tpu.vector_store %arg5[%c0_14, %c0_15, %c0_16], %33 {strides = array<i32>} : memref<1x1x1xf32, #tpu.memory_space<vmem>>, vector<1x1x1xf32>,
    return
  }
  func.func @transform_0(%arg0: i32, %arg1: i32) -> (i32, i32, i32) {
    %c0_i32 = arith.constant 0 : i32
    %c0_i32_0 = arith.constant 0 : i32
    return %arg0, %c0_i32, %arg1 : i32, i32, i32
  }
  func.func @transform_1(%arg0: i32, %arg1: i32) -> (i32, i32, i32) {
    %c0_i32 = arith.constant 0 : i32
    %c0_i32_0 = arith.constant 0 : i32
    return %arg0, %c0_i32, %arg1 : i32, i32, i32
  }
  func.func @transform_2(%arg0: i32, %arg1: i32) -> (i32, i32, i32) {
    %c1_i32 = arith.constant 1 : i32
    %0 = arith.muli %arg0, %c1_i32 : i32
    %1 = arith.addi %0, %arg1 : i32
    %c0_i32 = arith.constant 0 : i32
    %c0_i32_0 = arith.constant 0 : i32
    %c0_i32_1 = arith.constant 0 : i32
    return %1, %c0_i32, %c0_i32_0 : i32, i32, i32
  }
  func.func @transform_3(%arg0: i32, %arg1: i32) -> (i32, i32, i32) {
    %c1_i32 = arith.constant 1 : i32
    %0 = arith.muli %arg0, %c1_i32 : i32
    %1 = arith.addi %0, %arg1 : i32
    %c0_i32 = arith.constant 0 : i32
    %c0_i32_0 = arith.constant 0 : i32
    %c0_i32_1 = arith.constant 0 : i32
    return %1, %c0_i32, %c0_i32_0 : i32, i32, i32
  }
}

</mosaic_0001>

<bundles_post_ra>
// kernel: tpu_custom_call.1
= control target key start
LH: loop header
LB: loop body
LE: loop exit
PB: predicated region body
PF: predicated region fallthrough
CT: control target
= control target key end

     0   :  { %s624_s12 = smov 0   ;;  %s626_s13 = smov 0   ;;  %s721_s0 = inlined_call_operand.vmem [shape: f32[2,19,256], index: 0, kind: input, shape index: {}]   ;;  %s722_s1 = inlined_call_operand.vmem [shape: s32[2,1,256], index: 1, kind: input, shape index: {}]   ;;  %s723_s2 = inlined_call_operand.vmem [shape: f32[2,1,1], index: 2, kind: output, shape index: {0}]   ;;  %s724_s3 = inlined_call_operand.vmem [shape: f32[2,1,1], index: 3, kind: output, shape index: {1}]  }
   0x1   :  { %s628_s14 = smov 0  }
   0x2 LB: > { %s26_s15 = sadd.s32 1, %s596_s13  ;;  %p529_p0 = scmp.ge.s32.totalorder %s600_s14, 1  ;;  %s600_s14 = sphi %s628_s14, %s14_s14   ;;  %s596_s13 = sphi %s626_s13, %s726_s13   ;;  %s592_s12 = sphi %s624_s12, %s725_s12  }
   0x3   : > { %p28_p1 = scmp.ge.s32.totalorder %s26_s15, 2  ;;  %p179_p2 = scmp.lt.s32.totalorder %s600_s14, 3 }
   0x5   : > { %s728_s15 = smov (%p28_p1, %s26_s15), 0  ;;  %p180_p3 = pnand %p529_p0, %p179_p2 }
   0x6   : > { %p219_p4 = scmp.lt.s32.totalorder (!%p180_p3), %s592_s12, 1  ;;  %vm254_vm0 = vcmask (!%p180_p3), 1042432   ;;  %v315_v20 = vlaneseq (!%p180_p3)  ;;  %vm390_vm8 = vcmask (!%p180_p3), 1040384   ;;  %vm396_vm9 = vcmask (!%p180_p3), 0  }
   0x7   : > { %183 = sbr.rel (%p180_p3) target bundleno = 248 (0xf8), region = 28 }
   0x8   : > { %v661_v25 = vshrl.u32 (!%p180_p3), %v315_v20, 7 }
   0xa   : > { %v675_v36 = vsub.s32 (!%p180_p3), 0, %v661_v25  ;;  %v680_v39 = vsub.s32 (!%p180_p3), 1, %v661_v25  ;;  %v317_v41 = vadd.s32 (!%p180_p3), 8, %v661_v25  ;;  %v318_v43 = vadd.s32 (!%p180_p3), 16, %v661_v25 }
   0xe   : > { %s730_s12 = smov (!%p219_p4, %s592_s12), 1 }
   0xf   : > { %s535_s16 = smul.u32 48, %s730_s12  ;;  %s531_s20 = sshll.u32 %s730_s12, 1 }
  0x10   : > { %s235_s23 = scalar_lea.vmem %s722_s1, %s531_s20  ;;  %s240_s26 = scalar_lea.vmem %s723_s2, %s730_s12 }
  0x11   : > { %s226_s19 = scalar_lea.vmem %s721_s0, %s535_s16  ;;  %v677_v37 = vld [vmem:[%s235_s23] sm:$0x3]  ;;  %s245_s29 = scalar_lea.vmem %s724_s3, %s730_s12 }
  0x12   : > { %v247_v0 = vld [vmem:[%s226_s19] sm:$0xff]  ;;  %v248_v1 = vld [vmem:[%s226_s19 + $0x8] sm:$0xff]  ;;  %v249_v4 = vld [vmem:[%s226_s19 + $0x10] sm:$0xff]  ;;  %v322_v42 = vrot.slane %v677_v37, %v675_v36  ;;  %v326_v44 = vrot.slane %v677_v37, %v680_v39  ;;  %vm359_vm7 = vcmp.ne.s32.totalorder %v677_v37, 19 }
  0x13   : > { %v648_v2 = vld [vmem:[%s226_s19 + $0x20] sm:$0x7]  ;;  %v650_v3 = vld [vmem:[%s226_s19 + $0x28] sm:$0x7]  ;;  %v250_v5 = vld [vmem:[%s226_s19 + $0x18] sm:$0xff] }
  0x14   : > { %v255_v6 = vsel %vm254_vm0, %v648_v2, -inf  ;;  %v264_v7 = vsel %vm254_vm0, %v650_v3, -inf  ;;  %vm327_vm1 = vcmp.eq.s32.totalorder %v661_v25, %v322_v42  ;;  %vm329_vm2 = vcmp.eq.s32.totalorder %v317_v41, %v322_v42 }
  0x15   : > { %v256_v8 = vmax.f32 %v247_v0, %v255_v6  ;;  %v265_v9 = vmax.f32 %v248_v1, %v264_v7  ;;  %vm328_vm3 = vcmp.eq.s32.totalorder %v661_v25, %v326_v44  ;;  %vm330_vm4 = vcmp.eq.s32.totalorder %v317_v41, %v326_v44 }
  0x16   : > { %vm331_vm5 = vcmp.eq.s32.totalorder %v318_v43, %v322_v42  ;;  %vm332_vm6 = vcmp.eq.s32.totalorder %v318_v43, %v326_v44  ;;  %v333_v46 = vsel %vm327_vm1, %v247_v0, 0.0  ;;  %v335_v47 = vsel %vm329_vm2, %v249_v4, 0.0 }
  0x17   : > { %v257_v10 = vmax.f32 %v256_v8, %v249_v4  ;;  %v266_v11 = vmax.f32 %v265_v9, %v250_v5  ;;  %v334_v49 = vsel %vm328_vm3, %v248_v1, 0.0  ;;  %v336_v50 = vsel %vm330_vm4, %v250_v5, 0.0 }
  0x18   : > { %v337_v51 = vsel %vm331_vm5, %v648_v2, 0.0  ;;  %v338_v53 = vsel %vm332_vm6, %v650_v3, 0.0  ;;  %v339_v56 = vadd.f32 %v335_v47, %v333_v46  ;;  %v348_v60 = vadd.f32 %v336_v50, %v334_v49 }
  0x19   : > { %v258_v12 = vrot.slane %v257_v10, 4  ;;  %v267_v13 = vrot.slane %v266_v11, 4  ;;  %v340_v59 = vsel %vm254_vm0, %v337_v51, 0.0  ;;  %v349_v63 = vsel %vm254_vm0, %v338_v53, 0.0 }
  0x1a   : > { %v603_v49 = vmov 0.0  }
  0x1b   : > { %v259_v14 = vmax.f32 %v257_v10, %v258_v12  ;;  %v268_v15 = vmax.f32 %v266_v11, %v267_v13  ;;  %v532_v50 = vsel %vm359_vm7, 1.0, %v603_v49 }
  0x1c   : > { %v408_v53 = vrot.slane %v532_v50, %v680_v39 }
  0x1d   : > { %v260_v16 = vrot.slane %v259_v14, 2  ;;  %v269_v17 = vrot.slane %v268_v15, 2 }
  0x1e   : > { %v412_v37 = vsel %vm390_vm8, %v408_v53, 0.0 }
  0x1f   : > { %v261_v18 = vmax.f32 %v259_v14, %v260_v16  ;;  %v270_v19 = vmax.f32 %v268_v15, %v269_v17 }
  0x21   : > { %v262_v21 = vrot.slane %v261_v18, 1  ;;  %v271_v22 = vrot.slane %v270_v19, 1 }
  0x23   : > { %v657_v23 = vmax.f32 %v261_v18, %v262_v21  ;;  %v659_v24 = vmax.f32 %v270_v19, %v271_v22 }
  0x25   : > { %v273_v26 = vsub.f32 %v247_v0, %v657_v23  ;;  %v274_v27 = vsub.f32 %v248_v1, %v659_v24  ;;  %v275_v28 = vsub.f32 %v249_v4, %v657_v23  ;;  %v276_v29 = vsub.f32 %v250_v5, %v659_v24 }
  0x26   : > { %v277_v30 = vsub.f32 %v648_v2, %v657_v23  ;;  %v278_v31 = vsub.f32 %v650_v3, %v659_v24  ;;  %v341_v4 = vadd.f32 %v340_v59, %v339_v56  ;;  %v350_v3 = vadd.f32 %v349_v63, %v348_v60 }
  0x27   : > { %v279_v32 = vmul.f32 1.442695, %v273_v26  ;;  %v281_v33 = vmul.f32 1.442695, %v274_v27  ;;  %v283_v34 = vmul.f32 1.442695, %v275_v28 }
  0x28   : > { %v285_v35 = vmul.f32 1.442695, %v276_v29  ;;  %v287_v38 = vmul.f32 1.442695, %v277_v30  ;;  %v289_v40 = vmul.f32 1.442695, %v278_v31 }
  0x29   : > { %562 = vpow2.f32 %v279_v32  ;;  %v342_v9 = vrot.slane %v341_v4, 4  ;;  %v351_v11 = vrot.slane %v350_v3, 4  ;;  %v602_v30 = vmov 1966171168  }
  0x2a   : > { %564 = vpow2.f32 %v281_v33  ;;  %v364_v31 = vunpack.c.l.s4 %v602_v30 }
  0x2b   : > { %566 = vpow2.f32 %v283_v34  ;;  %v343_v15 = vadd.f32 %v342_v9, %v341_v4  ;;  %v352_v17 = vadd.f32 %v351_v11, %v350_v3 }
  0x2c   : > { %568 = vpow2.f32 %v285_v35  ;;  %v365_v41 = vunpack.c.0.s8 %v364_v31 }
  0x2d   : > { %570 = vpow2.f32 %v287_v38  ;;  %v344_v21 = vrot.slane %v343_v15, 2  ;;  %v353_v22 = vrot.slane %v352_v17, 2 }
  0x2e   : > { %572 = vpow2.f32 %v289_v40  ;;  %v368_v46 = vsub.s32 %v365_v41, %v661_v25 }
  0x2f   : > { %v345_v26 = vadd.f32 %v344_v21, %v343_v15  ;;  %v354_v27 = vadd.f32 %v353_v22, %v352_v17 }
  0x31   : > { %v346_v28 = vrot.slane %v345_v26, 1  ;;  %v355_v29 = vrot.slane %v354_v27, 1 }
  0x33   : > { %v563_v45 = vpop.eup %562  ;;  %v347_v35 = vadd.f32 %v346_v28, %v345_v26  ;;  %v356_v40 = vadd.f32 %v355_v29, %v354_v27 }
  0x34   : > { %v565_v48 = vpop.eup %564 }
  0x35   : > { %v567_v52 = vpop.eup %566 }
  0x36   : > { %v569_v54 = vpop.eup %568  ;;  %v291_v55 = vadd.f32 %v567_v52, %v563_v45  ;;  %v404_v52 = vrot.slane %v532_v50, %v675_v36 }
  0x37   : > { %v571_v57 = vpop.eup %570  ;;  %v300_v58 = vadd.f32 %v569_v54, %v565_v48 }
  0x38   : > { %v573_v61 = vpop.eup %572  ;;  %v292_v62 = vsel %vm254_vm0, %v571_v57, 0.0  ;;  %v411_v56 = vsel %vm390_vm8, %v404_v52, 0.0 }
  0x39   : > { %v293_v0 = vadd.f32 %v292_v62, %v291_v55  ;;  %v301_v1 = vsel %vm254_vm0, %v573_v61, 0.0 }
  0x3a   : > { %v302_v2 = vadd.f32 %v301_v1, %v300_v58  ;;  %v413_v58 = vadd.f32 %v412_v37, %v411_v56 }
  0x3b   : > { %v294_v5 = vrot.slane %v293_v0, 4 }
  0x3c   : > { %v303_v6 = vrot.slane %v302_v2, 4 }
  0x3d   : > { %v295_v7 = vadd.f32 %v294_v5, %v293_v0 }
  0x3e   : > { %v304_v8 = vadd.f32 %v303_v6, %v302_v2 }
  0x3f   : > { %v296_v10 = vrot.slane %v295_v7, 2 }
  0x40   : > { %v305_v12 = vrot.slane %v304_v8, 2 }
  0x41   : > { %v297_v13 = vadd.f32 %v296_v10, %v295_v7 }
  0x42   : > { %v306_v14 = vadd.f32 %v305_v12, %v304_v8 }
  0x43   : > { %v298_v16 = vrot.slane %v297_v13, 1 }
  0x44   : > { %v307_v18 = vrot.slane %v306_v14, 1 }
  0x45   : > { %v299_v19 = vadd.f32 %v298_v16, %v297_v13 }
  0x46   : > { %v308_v20 = vadd.f32 %v307_v18, %v306_v14 }
  0x47   : > { %574 = vlog2.f32 %v299_v19 }
  0x48   : > { %576 = vlog2.f32 %v308_v20 }
  0x51   : > { %v575_v32 = vpop.eup %574 }
  0x52   : > { %v577_v33 = vpop.eup %576  ;;  %v310_v34 = vmul.f32 0.6931472, %v575_v32 }
  0x53   : > { %v312_v38 = vmul.f32 0.6931472, %v577_v33 }
  0x54   : > { %v313_v42 = vadd.f32 %v310_v34, %v657_v23 }
  0x55   : > { %v314_v43 = vadd.f32 %v312_v38, %v659_v24 }
  0x56   : > { %v357_v44 = vsub.f32 %v313_v42, %v347_v35 }
  0x57   : > { %v358_v45 = vsub.f32 %v314_v43, %v356_v40 }
  0x59   : > { %v362_v47 = vcombine.low %v357_v44, %v358_v45 }
  0x5b   : > { %v369_v48 = vrot.slane %v362_v47, %v368_v46 }
  0x5d   : > { %v376_v51 = vrot.slane %v369_v48, %v368_v46 }
  0x5f   : > { %v378_v54 = vsel %vm359_vm7, %v376_v51, 0.0 }
  0x60   : > { %v383_v23 = vrot.slane %v378_v54, %v675_v36  ;;  %v387_v24 = vrot.slane %v378_v54, %v680_v39 }
  0x62   : > { %v391_v25 = vsel %vm390_vm8, %v383_v23, 0.0  ;;  %v392_v55 = vsel %vm390_vm8, %v387_v24, 0.0 }
  0x63   : > { %v393_v57 = vadd.f32 %v392_v55, %v391_v25 }
  0x65   : > { %394 = vadd.xlane.f32.xlu0 %v393_v57 }
  0x69   : > { %414 = vadd.xlane.f32.xlu0 %v413_v58 }
  0xf2   : > { %v395_v59 = vpop.xlane.xlu0 %394 }
  0xf3   : > { %397 = vst.msk [vmem:[%s240_s26] sm:$0x1] %vm396_vm9, %v395_v59 }
  0xf6   : > { %v415_v36 = vpop.xlane.xlu0 %414 }
  0xf7   : > { %416 = vst.msk [vmem:[%s245_s29] sm:$0x1] %vm396_vm9, %v415_v36 }
  0xf8 PF: > { %s14_s14 = sadd.s32 1, %s600_s14   ;;  %s725_s12 = smov %s596_s13 }
  0xf9   : > { %p11_p5 = scmp.ge.s32.totalorder %s14_s14, 4   ;;  %s726_s13 = smov %s728_s15 }
  0xfb   :  { %13 = sbr.rel (!%p11_p5) target bundleno = 2 (0x2), region = 73 }

</bundles_post_ra>
